<compile_context>
chip_gen: v5e
topology: v5e:2x2
jax: 0.10.0
libtpu: 0.0.40
codegen_flags: <defaults>
</compile_context>

<pallas_src>
import jax
import jax.numpy as jnp
from jax.experimental import pallas as pl
from jax.experimental.pallas import tpu as pltpu

block_size = 32
head_size = 16
n_embed = 128

LANE = 128  # TPU lane width; each of K/Q/V occupies one full lane group in w_qkv.


def head_kernel(x_ref, w_qkv_ref, o_ref):
    """Fused single-head causal attention over the whole batch (one invocation, no grid).

    x_ref     : (B, T, C)        VMEM, f32
    w_qkv_ref : (C, 3*LANE)      VMEM, bf16, columns = [K pad | Q*scale pad | V pad]
    o_ref     : (B, T, H)        VMEM, f32
    """
    B, T, C = x_ref.shape
    H = o_ref.shape[-1]

    # --- fused QKV projection: one (B*T, C) @ (C, 3*128) MXU matmul (bf16 in, f32 acc) ---
    x2d = x_ref[...].reshape(B * T, C).astype(jnp.bfloat16)
    qkv = jnp.dot(x2d, w_qkv_ref[...], preferred_element_type=jnp.float32)  # (B*T, 3*128)
    qkv = qkv.reshape(B, T, 3 * LANE)

    # 128-lane-aligned slices (no relayout); padded columns are exactly zero.
    k = qkv[:, :, 0:LANE]
    q = qkv[:, :, LANE:2 * LANE]          # scale C**-0.5 already folded into these columns
    v = qkv[:, :, 2 * LANE:3 * LANE]

    # --- attention scores (padded dims contribute 0 to the contraction) ---
    wei = jnp.einsum(
        "btd,bsd->bts",
        q.astype(jnp.bfloat16), k.astype(jnp.bfloat16),
        preferred_element_type=jnp.float32,
    )                                                                        # (B, T, T) f32

    # causal (lower-triangular) mask == tril[:T, :T]
    row = jax.lax.broadcasted_iota(jnp.int32, (T, T), 0)
    col = jax.lax.broadcasted_iota(jnp.int32, (T, T), 1)
    wei = jnp.where((col <= row)[None, :, :], wei, -jnp.inf)

    # numerically-stable softmax over the last axis, kept in f32 (v5e has no bf16 VPU/EUP)
    wei = wei - jnp.max(wei, axis=-1, keepdims=True)
    wei = jnp.exp(wei)
    wei = wei * pl.reciprocal(jnp.sum(wei, axis=-1, keepdims=True), approx=True)

    # --- weighted values; v is padded to 128 lanes (free on the MXU), store the real H ---
    out = jnp.einsum(
        "bts,bsh->bth",
        wei.astype(jnp.bfloat16), v.astype(jnp.bfloat16),
        preferred_element_type=jnp.float32,
    )                                                                        # (B, T, 128) f32
    o_ref[...] = out[:, :, :H].astype(o_ref.dtype)


def make_head_params(w_key, w_query, w_value):
    """One-time parameter prep (init-time, outside the per-call hot path).

    Returns a (C, 3*LANE) bf16 matrix with columns [K | Q * C**-0.5 | V], each zero-padded
    from head_size to a full 128-lane group.
    Note: the scale is C**-0.5 (n_embed), matching the PyTorch module's `C ** (-0.5)`
    (not the conventional head_size**-0.5).
    """
    C, H = w_key.shape
    scale = C ** -0.5

    def pad(w):
        return jnp.pad(w, ((0, 0), (0, LANE - H)))

    w_qkv = jnp.concatenate([pad(w_key), pad(w_query * scale), pad(w_value)], axis=1)
    return w_qkv.astype(jnp.bfloat16)


@jax.jit
def head_forward(x, w_qkv):
    """x: (B, T, C) f32; w_qkv: (C, 3*LANE) bf16 from make_head_params."""
    B, T, C = x.shape
    # Tiny footprint -> single full-block invocation: no grid, default full-array VMEM
    # blocks for inputs/outputs (removes the single-step grid-loop scaffolding).
    return pl.pallas_call(
        head_kernel,
        out_shape=jax.ShapeDtypeStruct((B, T, head_size), x.dtype),
    )(x, w_qkv)


def reference_forward(x, w_key, w_query, w_value):
    """Pure-JAX reference mirroring the PyTorch forward (eval mode)."""
    B, T, C = x.shape
    k = x @ w_key
    q = x @ w_query
    v = x @ w_value
    wei = (q @ jnp.swapaxes(k, -2, -1)) * (C ** -0.5)
    tril = jnp.tril(jnp.ones((T, T), dtype=bool))
    wei = jnp.where(tril, wei, -jnp.inf)
    wei = jax.nn.softmax(wei, axis=-1)
    return wei @ v


if __name__ == "__main__":
    key = jax.random.PRNGKey(0)
    kx, kk, kq, kv = jax.random.split(key, 4)

    B, T, C, H = 2, block_size, n_embed, head_size

    # Deterministic inputs / parameters (Kaiming-uniform-ish scale, like nn.Linear init).
    x = jax.random.normal(kx, (B, T, C), dtype=jnp.float32)
    bound = 1.0 / (C ** 0.5)
    w_key = jax.random.uniform(kk, (C, H), jnp.float32, -bound, bound)
    w_query = jax.random.uniform(kq, (C, H), jnp.float32, -bound, bound)
    w_value = jax.random.uniform(kv, (C, H), jnp.float32, -bound, bound)

    # Init-time weight prep (concat + pad + scale-fold + bf16 cast), done exactly once.
    w_qkv = make_head_params(w_key, w_query, w_value)

    out = head_forward(x, w_qkv)
    out = jax.block_until_ready(out)

    ref = reference_forward(x, w_key, w_query, w_value)
    assert out.shape == (B, T, H)
    # bf16 MXU inputs (f32 accumulation) + approx reciprocal -> loose tolerance vs pure-f32.
    assert jnp.allclose(out, ref, atol=2e-2, rtol=2e-2)

    print("KERNEL_OK")
</pallas_src>

<mosaic_0001>
module attributes {stable_mosaic.version = 11 : i64} {
  func.func @head_kernel(%arg0: memref<2x32x128xf32, #tpu.memory_space<vmem>>, %arg1: memref<128x384xbf16, #tpu.memory_space<vmem>>, %arg2: memref<2x32x16xf32, #tpu.memory_space<vmem>>) attributes {dimension_semantics = [], scalar_prefetch = 0 : i64, scratch_operands = 0 : i64, tpu.core_type = #tpu.core_type<tc>} {
    %c0 = arith.constant 0 : index
    %c0_0 = arith.constant 0 : index
    %c0_1 = arith.constant 0 : index
    %0 = vector.load %arg0[%c0, %c0_0, %c0_1] : memref<2x32x128xf32, #tpu.memory_space<vmem>>, vector<2x32x128xf32>
    %1 = vector.shape_cast %0 : vector<2x32x128xf32> to vector<64x128xf32>
    %2 = arith.truncf %1 : vector<64x128xf32> to vector<64x128xbf16>
    %c0_2 = arith.constant 0 : index
    %c0_3 = arith.constant 0 : index
    %3 = vector.load %arg1[%c0_2, %c0_3] : memref<128x384xbf16, #tpu.memory_space<vmem>>, vector<128x384xbf16>
    %cst = arith.constant dense<0.000000e+00> : vector<64x384xf32>
    %4 = tpu.matmul %2, %3, %cst {dimension_numbers = #tpu.dot_dimension_numbers<[1], [0], [0], [1], [0, 0, 1, 1], [], []>} : vector<64x128xbf16>, vector<128x384xbf16>, vector<64x384xf32> -> vector<64x384xf32>
    %5 = vector.shape_cast %4 : vector<64x384xf32> to vector<2x32x384xf32>
    %6 = vector.extract_strided_slice %5 {offsets = [0, 0, 0], sizes = [2, 32, 128], strides = [1, 1, 1]} : vector<2x32x384xf32> to vector<2x32x128xf32>
    %7 = vector.extract_strided_slice %5 {offsets = [0, 0, 128], sizes = [2, 32, 128], strides = [1, 1, 1]} : vector<2x32x384xf32> to vector<2x32x128xf32>
    %8 = vector.extract_strided_slice %5 {offsets = [0, 0, 256], sizes = [2, 32, 128], strides = [1, 1, 1]} : vector<2x32x384xf32> to vector<2x32x128xf32>
    %9 = arith.truncf %7 : vector<2x32x128xf32> to vector<2x32x128xbf16>
    %10 = arith.truncf %6 : vector<2x32x128xf32> to vector<2x32x128xbf16>
    "tpu.trace_start"() <{level = 10 : i32, message = "btd,bsd->bts"}> : () -> ()
    %cst_4 = arith.constant dense<0.000000e+00> : vector<2x32x32xf32>
    %11 = tpu.matmul %9, %10, %cst_4 {dimension_numbers = #tpu.dot_dimension_numbers<[2], [2], [1], [1], [0, 0, 0, 1, 1, 1], [0], [0]>} : vector<2x32x128xbf16>, vector<2x32x128xbf16>, vector<2x32x32xf32> -> vector<2x32x32xf32>
    "tpu.trace_stop"() : () -> ()
    %12 = tpu.iota {dimensions = array<i32: 0>} : vector<32x32xi32>
    %13 = tpu.iota {dimensions = array<i32: 1>} : vector<32x32xi32>
    %14 = arith.cmpi sle, %13, %12 : vector<32x32xi32>
    %15 = vector.shape_cast %14 : vector<32x32xi1> to vector<1x32x32xi1>
    %cst_5 = arith.constant 0xFF800000 : f32
    %16 = vector.shape_cast %15 : vector<1x32x32xi1> to vector<1x32x32xi1>
    %17 = vector.broadcast %16 : vector<1x32x32xi1> to vector<2x32x32xi1>
    %18 = vector.broadcast %cst_5 : f32 to vector<2x32x32xf32>
    %19 = arith.select %17, %11, %18 : vector<2x32x32xi1>, vector<2x32x32xf32>
    %cst_6 = arith.constant dense<0xFF800000> : vector<2x32xf32>
    %20 = vector.multi_reduction <maximumf>, %19, %cst_6 [2] : vector<2x32x32xf32> to vector<2x32xf32>
    %21 = vector.shape_cast %20 : vector<2x32xf32> to vector<2x32x1xf32>
    %22 = vector.broadcast %21 : vector<2x32x1xf32> to vector<2x32x32xf32>
    %23 = arith.subf %19, %22 : vector<2x32x32xf32>
    %24 = math.exp %23 : vector<2x32x32xf32>
    %cst_7 = arith.constant dense<0.000000e+00> : vector<2x32xf32>
    %25 = vector.multi_reduction <add>, %24, %cst_7 [2] : vector<2x32x32xf32> to vector<2x32xf32>
    %26 = vector.shape_cast %25 : vector<2x32xf32> to vector<2x32x1xf32>
    %27 = tpu.reciprocal %26 {approx = true} : vector<2x32x1xf32> -> vector<2x32x1xf32>
    %28 = vector.broadcast %27 : vector<2x32x1xf32> to vector<2x32x32xf32>
    %29 = arith.mulf %24, %28 : vector<2x32x32xf32>
    %30 = arith.truncf %29 : vector<2x32x32xf32> to vector<2x32x32xbf16>
    %31 = arith.truncf %8 : vector<2x32x128xf32> to vector<2x32x128xbf16>
    "tpu.trace_start"() <{level = 10 : i32, message = "bts,bsh->bth"}> : () -> ()
    %cst_8 = arith.constant dense<0.000000e+00> : vector<2x32x128xf32>
    %32 = tpu.matmul %30, %31, %cst_8 {dimension_numbers = #tpu.dot_dimension_numbers<[2], [1], [1], [2], [0, 0, 0, 1, 1, 2], [0], [0]>} : vector<2x32x32xbf16>, vector<2x32x128xbf16>, vector<2x32x128xf32> -> vector<2x32x128xf32>
    "tpu.trace_stop"() : () -> ()
    %33 = vector.extract_strided_slice %32 {offsets = [0, 0, 0], sizes = [2, 32, 16], strides = [1, 1, 1]} : vector<2x32x128xf32> to vector<2x32x16xf32>
    %c0_9 = arith.constant 0 : index
    %c0_10 = arith.constant 0 : index
    %c0_11 = arith.constant 0 : index
    %34 = vector.load %arg2[%c0_9, %c0_10, %c0_11] : memref<2x32x16xf32, #tpu.memory_space<vmem>>, vector<2x32x16xf32>
    tpu.vector_store %arg2[%c0_9, %c0_10, %c0_11], %33 {strides = array<i32>} : memref<2x32x16xf32, #tpu.memory_space<vmem>>, vector<2x32x16xf32>,
    return
  }
}

</mosaic_0001>

<bundles_post_ra>
// kernel: head_forward.1
= control target key start
LH: loop header
LB: loop body
LE: loop exit
PB: predicated region body
PF: predicated region fallthrough
CT: control target
= control target key end

     0   :  { %7 = vsyncpa [#allocation3], 0  ;;  %s1015_s0 = inlined_call_operand.hbm [shape: f32[2,32,128], index: 0, kind: input, shape index: {}]   ;;  %s1016_s1 = inlined_call_operand.hbm [shape: bf16[128,384], index: 1, kind: input, shape index: {}]   ;;  %s1017_s2 = inlined_call_operand.vmem [shape: f32[2,32,16], index: 2, kind: output, shape index: {}]  }
   0x1   :  { %s13_s11 = sshll.u32 %s1015_s0, 4  ;;  %s14_s11 = int_to_ptr.hbm [resolvable:$true] %s13_s11 }
   0x2   :  { %8 = vsyncpa [#allocation5], 0  ;;  %s862_s12 = smov [#allocation2]   ;;  %s26_s16 = sshll.u32 %s1016_s1, 4  ;;  %s27_s16 = int_to_ptr.hbm [resolvable:$true] %s26_s16 }
   0x3   :  { %s15_s13 = sshll.u32 %s862_s12, 4  ;;  %s863_s17 = smov 128   ;;  %s16_s13 = int_to_ptr.vmem [resolvable:$true] %s15_s13 }
   0x4   :  { %s864_s18 = smov 8   ;;  %s865_s19 = smov [#allocation4]  }
   0x5   :  { %21 = dma.hbm_to_vmem [thread:$0]  %s14_s11, 1024, %s16_s13, [#allocation3], %s863_s17, %s863_s17, %s864_s18  }
   0x6   :  { %s28_s20 = sshll.u32 %s865_s19, 4  ;;  %s866_s21 = smov 192   ;;  %s29_s20 = int_to_ptr.vmem [resolvable:$true] %s28_s20 }
   0x7   :  { %s867_s22 = smov 12  }
   0x8   :  { %34 = dma.hbm_to_vmem [thread:$0]  %s27_s16, 3072, %s29_s20, [#allocation5], %s866_s21, %s866_s21, %s867_s22  }
   0x9   :  { %858 = dma.done.wait [#allocation3], 1024  }
   0xa   :  { %859 = vsyncadd [#allocation3], 4294966272 }
   0xb   :  { %860 = dma.done.wait [#allocation5], 3072  }
   0xc   :  { %861 = vsyncadd [#allocation5], 4294964224  ;;  %v732_v0 = vld [vmem:[#allocation4 + $0xa8] sm:$0xf]  ;;  %v768_v1 = vld [vmem:[#allocation4 + $0xb0] sm:$0xf0] }
   0xd   :  { %v720_v2 = vld [vmem:[#allocation4 + $0x90] sm:$0xf]  ;;  %v733_v3 = vor.u32 %v768_v1, %v732_v0  ;;  %v765_v4 = vld [vmem:[#allocation4 + $0x98] sm:$0xf0]  ;;  %v708_v6 = vld [vmem:[#allocation4 + $0x78] sm:$0xf] }
   0xe   :  { %v721_v5 = vor.u32 %v765_v4, %v720_v2  ;;  %v762_v7 = vld [vmem:[#allocation4 + $0x80] sm:$0xf0]  ;;  %v767_v8 = vld [vmem:[#allocation4 + $0xac] sm:$0xf]  ;;  %v734_v9 = vld [vmem:[#allocation4 + $0xb4] sm:$0xf0] }
   0xf   :  { %216 = vmatpush.bf16.msra.mxu0 %v733_v3  ;;  %v764_v10 = vld [vmem:[#allocation4 + $0x94] sm:$0xf]  ;;  %v709_v11 = vor.u32 %v762_v7, %v708_v6  ;;  %v737_v12 = vor.u32 %v767_v8, %v734_v9  ;;  %v722_v13 = vld [vmem:[#allocation4 + $0x9c] sm:$0xf0]  ;;  %v759_v15 = vld [vmem:[#allocation4 + $0x68] sm:$0xf0] }
  0x10   :  { %v696_v14 = vld [vmem:[#allocation4 + $0x60] sm:$0xf]  ;;  %v725_v16 = vor.u32 %v764_v10, %v722_v13  ;;  %v761_v17 = vld [vmem:[#allocation4 + $0x7c] sm:$0xf]  ;;  %v710_v18 = vld [vmem:[#allocation4 + $0x84] sm:$0xf0] }
  0x11   :  { %245 = vmatpush.bf16.msra.mxu1 %v737_v12  ;;  %v697_v19 = vor.u32 %v759_v15, %v696_v14  ;;  %v684_v20 = vld [vmem:[#allocation4 + $0x48] sm:$0xf]  ;;  %v756_v21 = vld [vmem:[#allocation4 + $0x50] sm:$0xf0]  ;;  %v713_v22 = vor.u32 %v761_v17, %v710_v18  ;;  %v758_v23 = vld [vmem:[#allocation4 + $0x64] sm:$0xf] }
  0x12   :  { %v698_v24 = vld [vmem:[#allocation4 + $0x6c] sm:$0xf0]  ;;  %v685_v25 = vor.u32 %v756_v21, %v684_v20  ;;  %v753_v27 = vld [vmem:[#allocation4 + $0x38] sm:$0xf0]  ;;  %v755_v29 = vld [vmem:[#allocation4 + $0x4c] sm:$0xf] }
  0x13   :  { %217 = vmatpush.bf16.msra.mxu0 %v721_v5  ;;  %v672_v26 = vld [vmem:[#allocation4 + $0x30] sm:$0xf]  ;;  %v701_v28 = vor.u32 %v758_v23, %v698_v24  ;;  %v686_v30 = vld [vmem:[#allocation4 + $0x54] sm:$0xf0]  ;;  %v750_v33 = vld [vmem:[#allocation4 + $0x20] sm:$0xf0] }
  0x14   :  { %v673_v31 = vor.u32 %v753_v27, %v672_v26  ;;  %v660_v32 = vld [vmem:[#allocation4 + $0x18] sm:$0xf]  ;;  %v689_v34 = vor.u32 %v755_v29, %v686_v30  ;;  %v752_v35 = vld [vmem:[#allocation4 + $0x34] sm:$0xf]  ;;  %v674_v36 = vld [vmem:[#allocation4 + $0x3c] sm:$0xf0] }
  0x15   :  { %246 = vmatpush.bf16.msra.mxu1 %v725_v16  ;;  %v661_v37 = vor.u32 %v750_v33, %v660_v32  ;;  %v648_v38 = vld [vmem:[#allocation4] sm:$0xf]  ;;  %v747_v39 = vld [vmem:[#allocation4 + $0x8] sm:$0xf0]  ;;  %v677_v40 = vor.u32 %v752_v35, %v674_v36  ;;  %v749_v41 = vld [vmem:[#allocation4 + $0x1c] sm:$0xf] }
  0x16   :  { %v662_v42 = vld [vmem:[#allocation4 + $0x24] sm:$0xf0]  ;;  %v649_v43 = vor.u32 %v747_v39, %v648_v38  ;;  %v44_v44 = vld [vmem:[#allocation2] sm:$0xff]  ;;  %v650_v49 = vld [vmem:[#allocation4 + $0xc] sm:$0xf0]  ;;  %vm432_vm1 = vcmask 261120  }
  0x17   :  { %218 = vmatpush.bf16.msra.mxu0 %v709_v11  ;;  %v45_v45 = vld [vmem:[#allocation2 + $0x8] sm:$0xff]  ;;  %v665_v46 = vor.u32 %v749_v41, %v662_v42  ;;  %v746_v48 = vld [vmem:[#allocation4 + $0x4] sm:$0xf]  ;;  %v46_v51 = vld [vmem:[#allocation2 + $0x10] sm:$0xff]  ;;  %vm631_vm5 = vcmask 130048  }
  0x18   :  { %v889_v47 = vpack.c.bf16 %v45_v45, %v44_v44  ;;  %v653_v50 = vor.u32 %v746_v48, %v650_v49  ;;  %v47_v52 = vld [vmem:[#allocation2 + $0x18] sm:$0xff]  ;;  %v48_v54 = vld [vmem:[#allocation2 + $0x20] sm:$0xff]  ;;  %v49_v55 = vld [vmem:[#allocation2 + $0x28] sm:$0xff] }
  0x19   :  { %247 = vmatpush.bf16.msra.mxu1 %v713_v22  ;;  %v893_v53 = vpack.c.bf16 %v47_v52, %v46_v51  ;;  %v897_v56 = vpack.c.bf16 %v49_v55, %v48_v54  ;;  %v50_v57 = vld [vmem:[#allocation2 + $0x30] sm:$0xff]  ;;  %v51_v58 = vld [vmem:[#allocation2 + $0x38] sm:$0xff] }
  0x1a   :  { %v901_v59 = vpack.c.bf16 %v51_v58, %v50_v57  ;;  %v740_v54 = vld [vmem:[#allocation4 + $0xb0] sm:$0xf]  ;;  %v769_v55 = vld [vmem:[#allocation4 + $0xb8] sm:$0xf0]  ;;  %v728_v58 = vld [vmem:[#allocation4 + $0x98] sm:$0xf] }
  0x1b   :  { %219 = vmatpush.bf16.msra.mxu0 %v697_v19  ;;  %v741_v57 = vor.u32 %v769_v55, %v740_v54 }
  0x1d   :  { %248 = vmatpush.bf16.msra.mxu1 %v701_v28  ;;  %274 = vmatpush.bf16.msra.mxu2 %v741_v57 }
  0x1f   :  { %220 = vmatpush.bf16.msra.mxu0 %v685_v25 }
  0x21   :  { %249 = vmatpush.bf16.msra.mxu1 %v689_v34 }
  0x23   :  { %221 = vmatpush.bf16.msra.mxu0 %v673_v31 }
  0x25   :  { %250 = vmatpush.bf16.msra.mxu1 %v677_v40 }
  0x27   :  { %222 = vmatpush.bf16.msra.mxu0 %v661_v37 }
  0x29   :  { %251 = vmatpush.bf16.msra.mxu1 %v665_v46 }
  0x2b   :  { %223 = vmatpush.bf16.msra.mxu0 %v649_v43 }
  0x2d   :  { %252 = vmatpush.bf16.msra.mxu1 %v653_v50 }
  0x2e   :  { %224 = vmatmul.bf16.vlgmr.msra.gmra.mxu0 %v889_v47 }
  0x30   :  { %253 = vmatmul.bf16.vlgmr.msra.gmra.mxu1 %v889_v47 }
  0x3e   :  { %229 = vmatmul.bf16.gmra.mxu0 %v893_v53 }
  0x40   :  { %258 = vmatmul.bf16.gmra.mxu1 %v893_v53 }
  0x4e   :  { %234 = vmatmul.bf16.gmra.mxu0 %v897_v56 }
  0x50   :  { %263 = vmatmul.bf16.gmra.mxu1 %v897_v56 }
  0x5e   :  { %239 = vmatmul.bf16.gmra.mxu0 %v901_v59 }
  0x60   :  { %268 = vmatmul.bf16.gmra.mxu1 %v901_v59 }
  0xab   :  { %v225_v60 = vpop.f32.mrf.mxu0 }
  0xac   :  { %v311_v8 = vpack.c.bf16 %v225_v60, %v225_v60  ;;  %v766_v60 = vld [vmem:[#allocation4 + $0xa0] sm:$0xf0] }
  0xad   :  { %v254_v62 = vpop.f32.mrf.mxu1 }
  0xae   :  { %v335_v12 = vunpack.c.l.b16 %v311_v8  ;;  %v303_v13 = vpack.c.bf16 %v254_v62, %v254_v62  ;;  %v405_v62 = vlaneseq }
  0xb0   :  { %v323_v16 = vunpack.c.l.b16 %v303_v13 }
  0xb3   :  { %v227_v61 = vpop.f32.mrf.mxu0 }
  0xb4   :  { %v312_v6 = vpack.c.bf16 %v227_v61, %v227_v61  ;;  %v729_v61 = vor.u32 %v766_v60, %v728_v58 }
  0xb5   :  { %v256_v0 = vpop.f32.mrf.mxu1 }
  0xb6   :  { %v336_v11 = vunpack.c.l.b16 %v312_v6  ;;  %v304_v14 = vpack.c.bf16 %v256_v0, %v256_v0  ;;  %275 = vmatpush.bf16.msra.mxu2 %v729_v61  ;;  %v763_v0 = vld [vmem:[#allocation4 + $0x88] sm:$0xf0] }
  0xb8   :  { %v339_v15 = vpack.c.b16 %v336_v11, %v335_v12  ;;  %v324_v17 = vunpack.c.l.b16 %v304_v14  ;;  %v680_v14 = vld [vmem:[#allocation4 + $0x38] sm:$0xf] }
  0xba   :  { %v327_v20 = vpack.c.b16 %v324_v17, %v323_v16 }
  0xbb   :  { %v230_v63 = vpop.f32.mrf.mxu0 }
  0xbc   :  { %v313_v1 = vpack.c.bf16 %v230_v63, %v230_v63  ;;  %v716_v63 = vld [vmem:[#allocation4 + $0x80] sm:$0xf] }
  0xbd   :  { %v259_v9 = vpop.f32.mrf.mxu1 }
  0xbe   :  { %v337_v4 = vunpack.c.l.b16 %v313_v1  ;;  %v305_v23 = vpack.c.bf16 %v259_v9, %v259_v9  ;;  %v406_v1 = vshrl.u32 %v405_v62, 7  ;;  %v692_v9 = vld [vmem:[#allocation4 + $0x50] sm:$0xf] }
  0xc0   :  { %v325_v26 = vunpack.c.l.b16 %v305_v23  ;;  %v407_v12 = vadd.s32 8, %v406_v1 }
  0xc3   :  { %v232_v2 = vpop.f32.mrf.mxu0 }
  0xc4   :  { %v314_v3 = vpack.c.bf16 %v232_v2, %v232_v2  ;;  %v905_v2 = vand.u32 127, %v405_v62 }
  0xc5   :  { %v261_v19 = vpop.f32.mrf.mxu1 }
  0xc6   :  { %v338_v5 = vunpack.c.l.b16 %v314_v3  ;;  %v306_v24 = vpack.c.bf16 %v261_v19, %v261_v19  ;;  %v717_v3 = vor.u32 %v763_v0, %v716_v63  ;;  %vm412_vm0 = vcmp.le.s32.totalorder %v905_v2, %v406_v1  ;;  %v668_v19 = vld [vmem:[#allocation4 + $0x20] sm:$0xf] }
  0xc7   :  { %vm413_vm2 = vcmp.le.s32.totalorder %v905_v2, %v407_v12 }
  0xc8   :  { %v340_v7 = vpack.c.b16 %v338_v5, %v337_v4  ;;  %v326_v27 = vunpack.c.l.b16 %v306_v24  ;;  %v704_v4 = vld [vmem:[#allocation4 + $0x68] sm:$0xf]  ;;  %v760_v5 = vld [vmem:[#allocation4 + $0x70] sm:$0xf0]  ;;  %276 = vmatpush.bf16.msra.mxu2 %v717_v3 }
  0xc9   :  { %v705_v6 = vor.u32 %v760_v5, %v704_v4  ;;  %v656_v24 = vld [vmem:[#allocation4 + $0x8] sm:$0xf] }
  0xca   :  { %349 = vmatpush.bf16.xpose.msra.mxu3 %v340_v7  ;;  %v328_v32 = vpack.c.b16 %v326_v27, %v325_v26 }
  0xcb   :  { %v235_v10 = vpop.f32.mrf.mxu0 }
  0xcc   :  { %v315_v36 = vpack.c.bf16 %v235_v10, %v235_v10  ;;  %277 = vmatpush.bf16.msra.mxu2 %v705_v6  ;;  %v757_v10 = vld [vmem:[#allocation4 + $0x58] sm:$0xf0] }
  0xcd   :  { %v264_v22 = vpop.f32.mrf.mxu1  ;;  %v693_v13 = vor.u32 %v757_v10, %v692_v9 }
  0xce   :  { %v378_v38 = vunpack.c.l.b16 %v315_v36  ;;  %v307_v39 = vpack.c.bf16 %v264_v22, %v264_v22  ;;  %v408_v22 = vadd.s32 16, %v406_v1 }
  0xd0   :  { %v366_v43 = vunpack.c.l.b16 %v307_v39  ;;  %278 = vmatpush.bf16.msra.mxu2 %v693_v13  ;;  %vm414_vm3 = vcmp.le.s32.totalorder %v905_v2, %v408_v22 }
  0xd2   :  { %350 = vmatpush.bf16.xpose.msra.mxu3 %v339_v15  ;;  %v754_v15 = vld [vmem:[#allocation4 + $0x40] sm:$0xf0] }
  0xd3   :  { %v237_v18 = vpop.f32.mrf.mxu0  ;;  %v681_v16 = vor.u32 %v754_v15, %v680_v14 }
  0xd4   :  { %v316_v33 = vpack.c.bf16 %v237_v18, %v237_v18 }
  0xd5   :  { %v266_v35 = vpop.f32.mrf.mxu1  ;;  %279 = vmatpush.bf16.msra.mxu2 %v681_v16 }
  0xd6   :  { %v379_v37 = vunpack.c.l.b16 %v316_v33  ;;  %v308_v40 = vpack.c.bf16 %v266_v35, %v266_v35 }
  0xd8   :  { %v382_v41 = vpack.c.b16 %v379_v37, %v378_v38  ;;  %v367_v44 = vunpack.c.l.b16 %v308_v40 }
  0xd9   :  { %351 = vmatmul.bf16.vlgmr.msra.gmra.mxu3 %v327_v20  ;;  %v751_v20 = vld [vmem:[#allocation4 + $0x28] sm:$0xf0] }
  0xda   :  { %v370_v45 = vpack.c.b16 %v367_v44, %v366_v43  ;;  %v669_v23 = vor.u32 %v751_v20, %v668_v19 }
  0xdb   :  { %v240_v21 = vpop.f32.mrf.mxu0 }
  0xdc   :  { %v317_v25 = vpack.c.bf16 %v240_v21, %v240_v21  ;;  %280 = vmatpush.bf16.msra.mxu2 %v669_v23 }
  0xdd   :  { %v269_v42 = vpop.f32.mrf.mxu1 }
  0xde   :  { %v380_v30 = vunpack.c.l.b16 %v317_v25  ;;  %v309_v48 = vpack.c.bf16 %v269_v42, %v269_v42  ;;  %v748_v25 = vld [vmem:[#allocation4 + $0x10] sm:$0xf0] }
  0xdf   :  { %v657_v26 = vor.u32 %v748_v25, %v656_v24 }
  0xe0   :  { %v368_v50 = vunpack.c.l.b16 %v309_v48 }
  0xe1   :  { %281 = vmatpush.bf16.msra.mxu2 %v657_v26 }
  0xe3   :  { %v242_v28 = vpop.f32.mrf.mxu0 }
  0xe4   :  { %v318_v29 = vpack.c.bf16 %v242_v28, %v242_v28  ;;  %282 = vmatmul.bf16.vlgmr.msra.gmra.mxu2 %v889_v47 }
  0xe5   :  { %v271_v46 = vpop.f32.mrf.mxu1 }
  0xe6   :  { %v381_v31 = vunpack.c.l.b16 %v318_v29  ;;  %v310_v49 = vpack.c.bf16 %v271_v46, %v271_v46 }
  0xe8   :  { %v383_v34 = vpack.c.b16 %v381_v31, %v380_v30  ;;  %v369_v51 = vunpack.c.l.b16 %v310_v49  ;;  %v409_v30 = vadd.s32 24, %v406_v1 }
  0xe9   :  { %356 = vmatmul.bf16.gmra.mxu3 %v328_v32 }
  0xea   :  { %392 = vmatpush.bf16.xpose.msrb.mxu3 %v383_v34  ;;  %v371_v52 = vpack.c.b16 %v369_v51, %v368_v50  ;;  %vm415_vm4 = vcmp.le.s32.totalorder %v905_v2, %v409_v30 }
  0xf2   :  { %393 = vmatpush.bf16.xpose.msrb.mxu3 %v382_v41 }
  0xf4   :  { %287 = vmatmul.bf16.gmra.mxu2 %v893_v53 }
  0xf9   :  { %394 = vmatmul.bf16.vlgmr.msrb.gmra.mxu3 %v370_v45 }
 0x104   :  { %292 = vmatmul.bf16.gmra.mxu2 %v897_v56 }
 0x109   :  { %399 = vmatmul.bf16.gmra.mxu3 %v371_v52 }
 0x114   :  { %297 = vmatmul.bf16.gmra.mxu2 %v901_v59 }
 0x15c   :  { %v352_v7 = vpop.f32.mrf.mxu3 }
 0x15d   :  { %v424_v8 = vsel %vm412_vm0, %v352_v7, -inf }
 0x15e   :  { %v433_v11 = vsel %vm432_vm1, %v424_v8, -inf }
 0x15f   :  { %434 = vmax.xlane.f32.xlu0 %v433_v11 }
 0x164   :  { %v354_v17 = vpop.f32.mrf.mxu3 }
 0x165   :  { %v425_v18 = vsel %vm413_vm2, %v354_v17, -inf }
 0x166   :  { %v436_v21 = vsel %vm432_vm1, %v425_v18, -inf }
 0x167   :  { %437 = vmax.xlane.f32.xlu0 %v436_v21  ;;  %v283_v1 = vpop.f32.mrf.mxu2 }
 0x168   :  { %v529_v19 = vpack.c.bf16 %v283_v1, %v283_v1 }
 0x16c   :  { %v357_v27 = vpop.f32.mrf.mxu3 }
 0x16d   :  { %v426_v28 = vsel %vm414_vm3, %v357_v27, -inf }
 0x16e   :  { %v439_v29 = vsel %vm432_vm1, %v426_v28, -inf }
 0x16f   :  { %440 = vmax.xlane.f32.xlu1 %v439_v29  ;;  %v285_v7 = vpop.f32.mrf.mxu2 }
 0x170   :  { %v530_v20 = vpack.c.bf16 %v285_v7, %v285_v7 }
 0x172   :  { %v552_v29 = vunpack.c.l.b16 %v530_v20 }
 0x174   :  { %v359_v31 = vpop.f32.mrf.mxu3 }
 0x175   :  { %v427_v32 = vsel %vm415_vm4, %v359_v31, -inf }
 0x176   :  { %v442_v33 = vsel %vm432_vm1, %v427_v32, -inf }
 0x177   :  { %443 = vmax.xlane.f32.xlu1 %v442_v33  ;;  %v288_v13 = vpop.f32.mrf.mxu2 }
 0x17c   :  { %v395_v34 = vpop.f32.mrf.mxu3 }
 0x17d   :  { %v428_v35 = vsel %vm412_vm0, %v395_v34, -inf }
 0x17e   :  { %v445_v36 = vsel %vm432_vm1, %v428_v35, -inf }
 0x17f   :  { %446 = vmax.xlane.f32.xlu2 %v445_v36  ;;  %v290_v22 = vpop.f32.mrf.mxu2 }
 0x180   :  { %v532_v25 = vpack.c.bf16 %v290_v22, %v290_v22 }
 0x182   :  { %v554_v30 = vunpack.c.l.b16 %v532_v25 }
 0x184   :  { %v397_v37 = vpop.f32.mrf.mxu3 }
 0x185   :  { %v429_v47 = vsel %vm413_vm2, %v397_v37, -inf }
 0x186   :  { %v448_v38 = vsel %vm432_vm1, %v429_v47, -inf }
 0x187   :  { %449 = vmax.xlane.f32.xlu2 %v448_v38  ;;  %v293_v34 = vpop.f32.mrf.mxu2 }
 0x18c   :  { %v400_v39 = vpop.f32.mrf.mxu3 }
 0x18d   :  { %v430_v40 = vsel %vm414_vm3, %v400_v39, -inf }
 0x18e   :  { %v451_v41 = vsel %vm432_vm1, %v430_v40, -inf }
 0x18f   :  { %452 = vmax.xlane.f32.xlu0 %v451_v41  ;;  %v295_v37 = vpop.f32.mrf.mxu2 }
 0x194   :  { %v402_v42 = vpop.f32.mrf.mxu3 }
 0x195   :  { %v431_v53 = vsel %vm415_vm4, %v402_v42, -inf }
 0x196   :  { %v454_v43 = vsel %vm432_vm1, %v431_v53, -inf }
 0x197   :  { %455 = vmax.xlane.f32.xlu1 %v454_v43  ;;  %v533_v43 = vpack.c.bf16 %v293_v34, %v293_v34 }
 0x1d2   :  { %v435_v44 = vpop.xlane.xlu0 %434 }
 0x1d3   :  { %v457_v45 = vsub.f32 %v424_v8, %v435_v44  ;;  %v534_v44 = vpack.c.bf16 %v295_v37, %v295_v37 }
 0x1d5   :  { %v465_v46 = vmul.f32 1.442695, %v457_v45  ;;  %v598_v45 = vunpack.c.l.b16 %v533_v43 }
 0x1d7   :  { %778 = vpow2.f32 %v465_v46  ;;  %v599_v46 = vunpack.c.l.b16 %v534_v44 }
 0x1da   :  { %v438_v48 = vpop.xlane.xlu0 %437 }
 0x1db   :  { %v458_v49 = vsub.f32 %v425_v18, %v438_v48  ;;  %v531_v18 = vpack.c.bf16 %v288_v13, %v288_v13  ;;  %v602_v48 = vpack.c.b16 %v599_v46, %v598_v45 }
 0x1dd   :  { %v939_v50 = vpop.eup %778  ;;  %v467_v51 = vmul.f32 1.442695, %v458_v49  ;;  %v553_v24 = vunpack.c.l.b16 %v531_v18 }
 0x1de   :  { %v481_v56 = vsel %vm432_vm1, %v939_v50, 0.0 }
 0x1df   :  { %780 = vpow2.f32 %v467_v51  ;;  %482 = vadd.xlane.f32.xlu2 %v481_v56 }
 0x1e2   :  { %v441_v52 = vpop.xlane.xlu1 %440 }
 0x1e3   :  { %v459_v54 = vsub.f32 %v426_v28, %v441_v52  ;;  %v551_v28 = vunpack.c.l.b16 %v529_v19 }
 0x1e5   :  { %v943_v55 = vpop.eup %780  ;;  %v469_v57 = vmul.f32 1.442695, %v459_v54  ;;  %v555_v33 = vpack.c.b16 %v552_v29, %v551_v28 }
 0x1e6   :  { %v484_v59 = vsel %vm432_vm1, %v943_v55, 0.0 }
 0x1e7   :  { %782 = vpow2.f32 %v469_v57  ;;  %485 = vadd.xlane.f32.xlu0 %v484_v59 }
 0x1ea   :  { %v444_v58 = vpop.xlane.xlu1 %443 }
 0x1eb   :  { %v460_v60 = vsub.f32 %v427_v32, %v444_v58  ;;  %v556_v32 = vpack.c.b16 %v554_v30, %v553_v24 }
 0x1ed   :  { %v947_v61 = vpop.eup %782  ;;  %v471_v62 = vmul.f32 1.442695, %v460_v60  ;;  %571 = vmatpush.bf16.msra.mxu3 %v556_v32 }
 0x1ee   :  { %v487_v63 = vsel %vm432_vm1, %v947_v61, 0.0 }
 0x1ef   :  { %784 = vpow2.f32 %v471_v62  ;;  %488 = vadd.xlane.f32.xlu1 %v487_v63 }
 0x1f1   :  { %572 = vmatpush.bf16.msra.mxu3 %v555_v33 }
 0x1f2   :  { %v447_v0 = vpop.xlane.xlu2 %446 }
 0x1f3   :  { %v461_v2 = vsub.f32 %v428_v35, %v447_v0 }
 0x1f5   :  { %v951_v3 = vpop.eup %784  ;;  %v473_v4 = vmul.f32 1.442695, %v461_v2 }
 0x1f6   :  { %v490_v5 = vsel %vm432_vm1, %v951_v3, 0.0 }
 0x1f7   :  { %786 = vpow2.f32 %v473_v4  ;;  %491 = vadd.xlane.f32.xlu2 %v490_v5 }
 0x1fa   :  { %v450_v6 = vpop.xlane.xlu2 %449 }
 0x1fb   :  { %v462_v8 = vsub.f32 %v429_v47, %v450_v6  ;;  %v298_v47 = vpop.f32.mrf.mxu2 }
 0x1fc   :  { %v535_v38 = vpack.c.bf16 %v298_v47, %v298_v47 }
 0x1fd   :  { %v955_v9 = vpop.eup %786  ;;  %v475_v10 = vmul.f32 1.442695, %v462_v8 }
 0x1fe   :  { %v493_v11 = vsel %vm432_vm1, %v955_v9, 0.0 }
 0x1ff   :  { %788 = vpow2.f32 %v475_v10  ;;  %494 = vadd.xlane.f32.xlu0 %v493_v11 }
 0x202   :  { %v453_v12 = vpop.xlane.xlu0 %452 }
 0x203   :  { %v463_v14 = vsub.f32 %v430_v40, %v453_v12  ;;  %v300_v39 = vpop.f32.mrf.mxu2  ;;  %v600_v40 = vunpack.c.l.b16 %v535_v38 }
 0x204   :  { %v536_v41 = vpack.c.bf16 %v300_v39, %v300_v39 }
 0x205   :  { %v959_v15 = vpop.eup %788  ;;  %v477_v16 = vmul.f32 1.442695, %v463_v14 }
 0x206   :  { %v496_v17 = vsel %vm432_vm1, %v959_v15, 0.0  ;;  %v601_v42 = vunpack.c.l.b16 %v536_v41 }
 0x207   :  { %790 = vpow2.f32 %v477_v16  ;;  %497 = vadd.xlane.f32.xlu1 %v496_v17 }
 0x20a   :  { %v456_v21 = vpop.xlane.xlu1 %455 }
 0x20b   :  { %v464_v23 = vsub.f32 %v431_v53, %v456_v21  ;;  %v603_v53 = vpack.c.b16 %v601_v42, %v600_v40 }
 0x20d   :  { %v963_v26 = vpop.eup %790  ;;  %v479_v27 = vmul.f32 1.442695, %v464_v23  ;;  %618 = vmatpush.bf16.msrb.mxu0 %v603_v53  ;;  %770 = vmatpush.bf16.msrb.mxu1 %v603_v53 }
 0x20e   :  { %v499_v31 = vsel %vm432_vm1, %v963_v26, 0.0 }
 0x20f   :  { %792 = vpow2.f32 %v479_v27  ;;  %500 = vadd.xlane.f32.xlu2 %v499_v31 }
 0x211   :  { %619 = vmatpush.bf16.msrb.mxu0 %v602_v48  ;;  %771 = vmatpush.bf16.msrb.mxu1 %v602_v48 }
 0x215   :  { %v967_v35 = vpop.eup %792 }
 0x216   :  { %v502_v36 = vsel %vm432_vm1, %v967_v35, 0.0 }
 0x217   :  { %503 = vadd.xlane.f32.xlu0 %v502_v36 }
 0x252   :  { %v483_v49 = vpop.xlane.xlu2 %482 }
 0x253   :  { %794 = vrcp.f32 %v483_v49 }
 0x259   :  { %v795_v56 = vpop.eup %794 }
 0x25a   :  { %v486_v51 = vpop.xlane.xlu0 %485  ;;  %v513_v52 = vmul.f32 %v795_v56, %v939_v50 }
 0x25b   :  { %796 = vrcp.f32 %v486_v51 }
 0x25c   :  { %v521_v57 = vpack.c.bf16 %v513_v52, %v513_v52 }
 0x25e   :  { %v541_v62 = vunpack.c.l.b16 %v521_v57 }
 0x261   :  { %v797_v54 = vpop.eup %796 }
 0x262   :  { %v514_v59 = vmul.f32 %v797_v54, %v943_v55  ;;  %v489_v58 = vpop.xlane.xlu1 %488 }
 0x263   :  { %798 = vrcp.f32 %v489_v58 }
 0x264   :  { %v522_v60 = vpack.c.bf16 %v514_v59, %v514_v59 }
 0x266   :  { %v542_v63 = vunpack.c.l.b16 %v522_v60 }
 0x268   :  { %v545_v0 = vpack.c.b16 %v542_v63, %v541_v62 }
 0x269   :  { %v799_v2 = vpop.eup %798 }
 0x26a   :  { %v492_v1 = vpop.xlane.xlu2 %491  ;;  %742 = vmatmul.msk.bf16.vlgmr.msra.gmra.mxu3 %vm432_vm1, %v545_v0  ;;  %v515_v4 = vmul.f32 %v799_v2, %v947_v61 }
 0x26b   :  { %800 = vrcp.f32 %v492_v1 }
 0x26c   :  { %v523_v7 = vpack.c.bf16 %v515_v4, %v515_v4 }
 0x26e   :  { %v543_v55 = vunpack.c.l.b16 %v523_v7 }
 0x271   :  { %v801_v5 = vpop.eup %800 }
 0x272   :  { %v495_v6 = vpop.xlane.xlu0 %494  ;;  %v516_v50 = vmul.f32 %v801_v5, %v951_v3 }
 0x273   :  { %802 = vrcp.f32 %v495_v6 }
 0x274   :  { %v524_v8 = vpack.c.bf16 %v516_v50, %v516_v50 }
 0x276   :  { %v544_v10 = vunpack.c.l.b16 %v524_v8 }
 0x278   :  { %v546_v11 = vpack.c.b16 %v544_v10, %v543_v55 }
 0x279   :  { %v803_v13 = vpop.eup %802 }
 0x27a   :  { %743 = vmatmul.msk.bf16.gmra.mxu3 %vm432_vm1, %v546_v11  ;;  %v498_v12 = vpop.xlane.xlu1 %497  ;;  %v517_v14 = vmul.f32 %v803_v13, %v955_v9 }
 0x27b   :  { %804 = vrcp.f32 %v498_v12 }
 0x27c   :  { %v525_v17 = vpack.c.bf16 %v517_v14, %v517_v14 }
 0x27e   :  { %v588_v3 = vunpack.c.l.b16 %v525_v17 }
 0x281   :  { %v805_v16 = vpop.eup %804 }
 0x282   :  { %v518_v61 = vmul.f32 %v805_v16, %v959_v15  ;;  %v501_v18 = vpop.xlane.xlu2 %500 }
 0x283   :  { %806 = vrcp.f32 %v501_v18 }
 0x284   :  { %v526_v19 = vpack.c.bf16 %v518_v61, %v518_v61 }
 0x286   :  { %v589_v20 = vunpack.c.l.b16 %v526_v19 }
 0x288   :  { %v592_v21 = vpack.c.b16 %v589_v20, %v588_v3 }
 0x289   :  { %v807_v23 = vpop.eup %806 }
 0x28a   :  { %v504_v22 = vpop.xlane.xlu0 %503  ;;  %744 = vmatmul.msk.bf16.vlgmr.msrb.gmra.mxu0 %vm432_vm1, %v592_v21  ;;  %v519_v24 = vmul.f32 %v807_v23, %v963_v26 }
 0x28b   :  { %808 = vrcp.f32 %v504_v22 }
 0x28c   :  { %v527_v27 = vpack.c.bf16 %v519_v24, %v519_v24 }
 0x28e   :  { %v590_v29 = vunpack.c.l.b16 %v527_v27 }
 0x291   :  { %v809_v25 = vpop.eup %808 }
 0x292   :  { %v520_v9 = vmul.f32 %v809_v25, %v967_v35 }
 0x294   :  { %v528_v28 = vpack.c.bf16 %v520_v9, %v520_v9 }
 0x296   :  { %v591_v15 = vunpack.c.l.b16 %v528_v28 }
 0x298   :  { %v593_v30 = vpack.c.b16 %v591_v15, %v590_v29 }
 0x29a   :  { %745 = vmatmul.msk.bf16.vlgmr.msrb.gmra.mxu1 %vm432_vm1, %v593_v30 }
 0x2ed   :  { %v574_v31 = vpop.f32.mrf.mxu3 }
 0x2ee   :  { %632 = vst.msk [vmem:[%s1017_s2] sm:$0xff] %vm631_vm5, %v574_v31 }
 0x2f5   :  { %v576_v32 = vpop.f32.mrf.mxu3 }
 0x2f6   :  { %633 = vst.msk [vmem:[%s1017_s2 + $0x8] sm:$0xff] %vm631_vm5, %v576_v32 }
 0x2fd   :  { %v579_v26 = vpop.f32.mrf.mxu3 }
 0x2fe   :  { %634 = vst.msk [vmem:[%s1017_s2 + $0x10] sm:$0xff] %vm631_vm5, %v579_v26 }
 0x305   :  { %v581_v33 = vpop.f32.mrf.mxu3 }
 0x306   :  { %635 = vst.msk [vmem:[%s1017_s2 + $0x18] sm:$0xff] %vm631_vm5, %v581_v33 }
 0x307   :  { %v621_v34 = vpop.f32.mrf.mxu0 }
 0x308   :  { %636 = vst.msk [vmem:[%s1017_s2 + $0x20] sm:$0xff] %vm631_vm5, %v621_v34 }
 0x30f   :  { %v623_v35 = vpop.f32.mrf.mxu0 }
 0x310   :  { %637 = vst.msk [vmem:[%s1017_s2 + $0x28] sm:$0xff] %vm631_vm5, %v623_v35 }
 0x317   :  { %v626_v36 = vpop.f32.mrf.mxu1 }
 0x318   :  { %638 = vst.msk [vmem:[%s1017_s2 + $0x30] sm:$0xff] %vm631_vm5, %v626_v36 }
 0x31f   :  { %v628_v37 = vpop.f32.mrf.mxu1 }
 0x320   :  { %639 = vst.msk [vmem:[%s1017_s2 + $0x38] sm:$0xff] %vm631_vm5, %v628_v37 }
 0x321   :  { %644 = vsyncpa [#allocation3], 1 }
 0x322   :  { %645 = vsyncpa [#allocation5], 1 }

</bundles_post_ra>
